<compile_context>
chip_gen: v7x
topology: tpu7x:2x2x1
jax: 0.10.0
libtpu: 0.0.40
codegen_flags: <defaults>
</compile_context>

<pallas_src>
import jax
import jax.numpy as jnp
from jax.experimental import pallas as pl
from jax.experimental.pallas import tpu as pltpu


def _round_up(v, m):
    return (v + m - 1) // m * m


def _iclassifier_kernel(x_ref, w_fe_ref, b_fe_ref, w_fc_ref, b_fc_ref,
                        feats_ref, c_ref):
    # feature_extractor: Linear(in_dim -> feature_size).  Weights arrive
    # pre-transposed as (K, F) -> straight MXU matmul, f32 accumulation.
    # The cast of the x tile happens here (VPU, hidden under the MXU) instead
    # of as a separate XLA pass over all of x.
    x = x_ref[...].astype(w_fe_ref.dtype)
    feats = jnp.dot(x, w_fe_ref[...],
                    preferred_element_type=jnp.float32) + b_fe_ref[...]
    feats_ref[...] = feats.astype(feats_ref.dtype)        # feats.view(N, -1)

    # fc: Linear(feature_size -> output_class), fed from the *stored* feats
    # block (matches the PyTorch dataflow, and avoids a second live temporary).
    c = jnp.dot(feats_ref[...].astype(w_fc_ref.dtype), w_fc_ref[...],
                preferred_element_type=jnp.float32) + b_fc_ref[...]
    c_ref[...] = c.astype(c_ref.dtype)


def iclassifier_forward(x, w_fe, b_fe, w_fc, b_fc, *,
                        tile_n=512, compute_dtype=None, feats_dtype=None):
    """IClassifier.forward: returns (feats, c) like the PyTorch module.

    w_fe, w_fc are PyTorch-layout Linear weights (out_features, in_features);
    b_fe, b_fc are 1-D biases.  `compute_dtype=jnp.bfloat16` enables the
    bf16-input / f32-accumulate MXU path; `feats_dtype=jnp.bfloat16` halves the
    dominant feats HBM write when the downstream bag head tolerates it.
    """
    n, in_dim = x.shape
    feature_size = w_fe.shape[0]
    output_class = w_fc.shape[0]

    x_dt = jnp.dtype(x.dtype)
    cdt = jnp.dtype(compute_dtype) if compute_dtype is not None else x_dt
    feats_dt = jnp.dtype(feats_dtype) if feats_dtype is not None else x_dt
    c_dt = x_dt                                   # bag scores stay full precision

    # Row tile: guarantee >= 2 grid steps when possible (both v7x TCs busy),
    # sublane-aligned, then shrink until the VMEM working set fits the budget.
    tile_n = max(8, _round_up(min(tile_n, max(1, -(-n // 2))), 8))

    def vmem_estimate(tn):
        x_tile = tn * in_dim * x_dt.itemsize
        f_tile = tn * feature_size * feats_dt.itemsize
        c_tile = tn * output_class * c_dt.itemsize
        w_bytes = (in_dim * feature_size + feature_size * output_class) * cdt.itemsize
        b_bytes = (feature_size + output_class) * 4
        # in-kernel temporaries: cast x tile + f32 accumulators for both matmuls
        tmp = tn * (in_dim * cdt.itemsize + (feature_size + output_class) * 4)
        # x/feats/c are double-buffered by the pipeline; weights are Buffered(1)
        return 2 * (x_tile + f_tile + c_tile) + w_bytes + b_bytes + tmp

    budget = 40 * 1024 * 1024                     # fits v7x's 64 MiB physical VMEM
    while tile_n > 64 and vmem_estimate(tile_n) > budget:
        tile_n = max(64, _round_up(tile_n // 2, 8))

    grid = (pl.cdiv(n, tile_n),)                  # partial last block is masked
    vmem_limit = int(min(64 * 1024 * 1024,
                         max(32 * 1024 * 1024,
                             1.3 * vmem_estimate(tile_n) + (2 << 20))))

    # Pre-transpose the (tiny) weights to (in, out); no in-kernel transpose.
    w_fe_t = w_fe.T.astype(cdt)                           # (in_dim, feature_size)
    w_fc_t = w_fc.T.astype(cdt)                           # (feature_size, output_class)
    b_fe_2d = b_fe.reshape(1, feature_size).astype(jnp.float32)
    b_fc_2d = b_fc.reshape(1, output_class).astype(jnp.float32)

    def resident_spec(shape):
        # Constant-index blocks: DMA'd once; single-buffer them to halve VMEM.
        return pl.BlockSpec(shape, lambda i: (0, 0), pipeline_mode=pl.Buffered(1))

    cost = pl.CostEstimate(
        flops=2 * n * (in_dim * feature_size + feature_size * output_class),
        transcendentals=0,
        bytes_accessed=(n * in_dim * x_dt.itemsize
                        + (in_dim * feature_size
                           + feature_size * output_class) * cdt.itemsize
                        + (feature_size + output_class) * 4
                        + n * feature_size * feats_dt.itemsize
                        + n * output_class * c_dt.itemsize))

    feats, c = pl.pallas_call(
        _iclassifier_kernel,
        out_shape=(jax.ShapeDtypeStruct((n, feature_size), feats_dt),
                   jax.ShapeDtypeStruct((n, output_class), c_dt)),
        grid=grid,
        in_specs=[
            pl.BlockSpec((tile_n, in_dim), lambda i: (i, 0)),   # x: row-tiled, 2-deep pipeline
            resident_spec((in_dim, feature_size)),              # w_fe: resident
            resident_spec((1, feature_size)),                   # b_fe: resident
            resident_spec((feature_size, output_class)),        # w_fc: resident
            resident_spec((1, output_class)),                   # b_fc: resident
        ],
        out_specs=(
            pl.BlockSpec((tile_n, feature_size), lambda i: (i, 0)),
            pl.BlockSpec((tile_n, output_class), lambda i: (i, 0)),
        ),
        compiler_params=pltpu.CompilerParams(
            dimension_semantics=("parallel",),
            vmem_limit_bytes=vmem_limit),
        cost_estimate=cost,
    )(x, w_fe_t, b_fe_2d, w_fc_t, b_fc_2d)

    return feats, c


def _reference(x, w_fe, b_fe, w_fc, b_fc):
    feats = x @ w_fe.T + b_fe
    c = feats @ w_fc.T + b_fc
    return feats, c


if __name__ == "__main__":
    # Small shapes consistent with the module: a bag of N instances,
    # in_dim-dimensional patch embeddings -> feature_size -> output_class.
    # N=24 deliberately exercises the partial (masked) last row block.
    N, IN_DIM, FEATURE_SIZE, OUTPUT_CLASS = 24, 32, 32, 4

    key = jax.random.PRNGKey(0)
    k_x, k_wfe, k_bfe, k_wfc, k_bfc = jax.random.split(key, 5)

    x = jax.random.normal(k_x, (N, IN_DIM), dtype=jnp.float32)
    # PyTorch Linear layouts: weight (out_features, in_features), bias (out,)
    w_fe = jax.random.normal(k_wfe, (FEATURE_SIZE, IN_DIM), jnp.float32) * 0.05
    b_fe = jax.random.normal(k_bfe, (FEATURE_SIZE,), jnp.float32) * 0.05
    w_fc = jax.random.normal(k_wfc, (OUTPUT_CLASS, FEATURE_SIZE), jnp.float32) * 0.05
    b_fc = jax.random.normal(k_bfc, (OUTPUT_CLASS,), jnp.float32) * 0.05

    feats_ref, c_ref = _reference(x, w_fe, b_fe, w_fc, b_fc)

    # f32 path (matches the PyTorch module numerics).
    feats, c = jax.block_until_ready(
        iclassifier_forward(x, w_fe, b_fe, w_fc, b_fc))
    assert feats.shape == (N, FEATURE_SIZE) and feats.dtype == x.dtype
    assert c.shape == (N, OUTPUT_CLASS) and c.dtype == x.dtype
    assert jnp.allclose(feats, feats_ref, atol=1e-5, rtol=1e-5)
    assert jnp.allclose(c, c_ref, atol=1e-5, rtol=1e-5)

    # bf16-compute / bf16-feats path (MXU + HBM friendly on v5e/v6e/v7x).
    feats_bf, c_bf = jax.block_until_ready(
        iclassifier_forward(x, w_fe, b_fe, w_fc, b_fc,
                            compute_dtype=jnp.bfloat16,
                            feats_dtype=jnp.bfloat16))
    assert feats_bf.dtype == jnp.bfloat16
    assert jnp.allclose(feats_bf.astype(jnp.float32), feats_ref,
                        atol=5e-2, rtol=5e-2)
    assert jnp.allclose(c_bf, c_ref, atol=5e-2, rtol=5e-2)

    print("KERNEL_OK")
</pallas_src>

<mosaic_0001>
module attributes {stable_mosaic.version = 11 : i64} {
  func.func @_iclassifier_kernel(%arg0: i32, %arg1: memref<16x32xf32, #tpu.memory_space<vmem>>, %arg2: memref<32x32xf32, #tpu.memory_space<vmem>>, %arg3: memref<1x32xf32, #tpu.memory_space<vmem>>, %arg4: memref<32x4xf32, #tpu.memory_space<vmem>>, %arg5: memref<1x4xf32, #tpu.memory_space<vmem>>, %arg6: memref<16x32xf32, #tpu.memory_space<vmem>>, %arg7: memref<16x4xf32, #tpu.memory_space<vmem>>) attributes {dimension_semantics = [#tpu.dimension_semantics<parallel>], iteration_bounds = array<i64: 2>, scalar_prefetch = 0 : i64, scratch_operands = 0 : i64, tpu.core_type = #tpu.core_type<tc>, window_params = [{transform_indices = @transform_0, window_bounds = array<i64: 16, 32>}, {pipeline_mode = #tpu.pipeline_mode<synchronous>, transform_indices = @transform_1, window_bounds = array<i64: 32, 32>}, {pipeline_mode = #tpu.pipeline_mode<synchronous>, transform_indices = @transform_2, window_bounds = array<i64: 1, 32>}, {pipeline_mode = #tpu.pipeline_mode<synchronous>, transform_indices = @transform_3, window_bounds = array<i64: 32, 4>}, {pipeline_mode = #tpu.pipeline_mode<synchronous>, transform_indices = @transform_4, window_bounds = array<i64: 1, 4>}, {transform_indices = @transform_5, window_bounds = array<i64: 16, 32>}, {transform_indices = @transform_6, window_bounds = array<i64: 16, 4>}]} {
    %c0 = arith.constant 0 : index
    %c0_0 = arith.constant 0 : index
    %0 = vector.load %arg1[%c0, %c0_0] : memref<16x32xf32, #tpu.memory_space<vmem>>, vector<16x32xf32>
    %c0_1 = arith.constant 0 : index
    %c0_2 = arith.constant 0 : index
    %1 = vector.load %arg2[%c0_1, %c0_2] : memref<32x32xf32, #tpu.memory_space<vmem>>, vector<32x32xf32>
    %cst = arith.constant dense<0.000000e+00> : vector<16x32xf32>
    %2 = tpu.matmul %0, %1, %cst {dimension_numbers = #tpu.dot_dimension_numbers<[1], [0], [0], [1], [0, 0, 1, 1], [], []>} : vector<16x32xf32>, vector<32x32xf32>, vector<16x32xf32> -> vector<16x32xf32>
    %c0_3 = arith.constant 0 : index
    %c0_4 = arith.constant 0 : index
    %3 = vector.load %arg3[%c0_3, %c0_4] : memref<1x32xf32, #tpu.memory_space<vmem>>, vector<1x32xf32>
    %4 = vector.broadcast %3 : vector<1x32xf32> to vector<16x32xf32>
    %5 = arith.addf %2, %4 : vector<16x32xf32>
    %c0_5 = arith.constant 0 : index
    %c0_6 = arith.constant 0 : index
    %6 = vector.load %arg6[%c0_5, %c0_6] : memref<16x32xf32, #tpu.memory_space<vmem>>, vector<16x32xf32>
    tpu.vector_store %arg6[%c0_5, %c0_6], %5 {strides = array<i32>} : memref<16x32xf32, #tpu.memory_space<vmem>>, vector<16x32xf32>,
    %c0_7 = arith.constant 0 : index
    %c0_8 = arith.constant 0 : index
    %7 = vector.load %arg6[%c0_7, %c0_8] : memref<16x32xf32, #tpu.memory_space<vmem>>, vector<16x32xf32>
    %c0_9 = arith.constant 0 : index
    %c0_10 = arith.constant 0 : index
    %8 = vector.load %arg4[%c0_9, %c0_10] : memref<32x4xf32, #tpu.memory_space<vmem>>, vector<32x4xf32>
    %cst_11 = arith.constant dense<0.000000e+00> : vector<16x4xf32>
    %9 = tpu.matmul %7, %8, %cst_11 {dimension_numbers = #tpu.dot_dimension_numbers<[1], [0], [0], [1], [0, 0, 1, 1], [], []>} : vector<16x32xf32>, vector<32x4xf32>, vector<16x4xf32> -> vector<16x4xf32>
    %c0_12 = arith.constant 0 : index
    %c0_13 = arith.constant 0 : index
    %10 = vector.load %arg5[%c0_12, %c0_13] : memref<1x4xf32, #tpu.memory_space<vmem>>, vector<1x4xf32>
    %11 = vector.broadcast %10 : vector<1x4xf32> to vector<16x4xf32>
    %12 = arith.addf %9, %11 : vector<16x4xf32>
    %c0_14 = arith.constant 0 : index
    %c0_15 = arith.constant 0 : index
    %13 = vector.load %arg7[%c0_14, %c0_15] : memref<16x4xf32, #tpu.memory_space<vmem>>, vector<16x4xf32>
    tpu.vector_store %arg7[%c0_14, %c0_15], %12 {strides = array<i32>} : memref<16x4xf32, #tpu.memory_space<vmem>>, vector<16x4xf32>,
    return
  }
  func.func @transform_0(%arg0: i32) -> (i32, i32) {
    %c0_i32 = arith.constant 0 : i32
    %c0_i32_0 = arith.constant 0 : i32
    return %arg0, %c0_i32 : i32, i32
  }
  func.func @transform_1(%arg0: i32) -> (i32, i32) {
    %c0_i32 = arith.constant 0 : i32
    %c0_i32_0 = arith.constant 0 : i32
    %c0_i32_1 = arith.constant 0 : i32
    return %c0_i32, %c0_i32_0 : i32, i32
  }
  func.func @transform_2(%arg0: i32) -> (i32, i32) {
    %c0_i32 = arith.constant 0 : i32
    %c0_i32_0 = arith.constant 0 : i32
    %c0_i32_1 = arith.constant 0 : i32
    return %c0_i32, %c0_i32_0 : i32, i32
  }
  func.func @transform_3(%arg0: i32) -> (i32, i32) {
    %c0_i32 = arith.constant 0 : i32
    %c0_i32_0 = arith.constant 0 : i32
    %c0_i32_1 = arith.constant 0 : i32
    return %c0_i32, %c0_i32_0 : i32, i32
  }
  func.func @transform_4(%arg0: i32) -> (i32, i32) {
    %c0_i32 = arith.constant 0 : i32
    %c0_i32_0 = arith.constant 0 : i32
    %c0_i32_1 = arith.constant 0 : i32
    return %c0_i32, %c0_i32_0 : i32, i32
  }
  func.func @transform_5(%arg0: i32) -> (i32, i32) {
    %c0_i32 = arith.constant 0 : i32
    %c0_i32_0 = arith.constant 0 : i32
    return %arg0, %c0_i32 : i32, i32
  }
  func.func @transform_6(%arg0: i32) -> (i32, i32) {
    %c0_i32 = arith.constant 0 : i32
    %c0_i32_0 = arith.constant 0 : i32
    return %arg0, %c0_i32 : i32, i32
  }
}

</mosaic_0001>

<bundles_post_ra>
// kernel: tpu_custom_call.1
= control target key start
LH: loop header
LB: loop body
LE: loop exit
PB: predicated region body
PF: predicated region fallthrough
CT: control target
= control target key end

     0   :  { %12 = vsyncpa [#allocation3], 0  ;;  %s1441_s0 = inlined_call_operand.hbm [shape: f32[24,32], index: 0, kind: input, shape index: {}]   ;;  %s1442_s1 = inlined_call_operand.vmem [shape: f32[32,32], index: 1, kind: input, shape index: {}]   ;;  %s1443_s2 = inlined_call_operand.vmem [shape: f32[1,32], index: 2, kind: input, shape index: {}]   ;;  %s1444_s3 = inlined_call_operand.vmem [shape: f32[32,4], index: 3, kind: input, shape index: {}]   ;;  %s1445_s4 = inlined_call_operand.vmem [shape: f32[1,4], index: 4, kind: input, shape index: {}]   ;;  %s1446_s5 = inlined_call_operand.hbm [shape: f32[24,32], index: 5, kind: output, shape index: {0}]   ;;  %s1447_s6 = inlined_call_operand.vmem [shape: f32[24,4], index: 6, kind: output, shape index: {1}]  }
   0x1   :  { %14 = vsyncpa [#allocation3 + $0x1], 0 }
   0x2   :  { %15 = vsyncpa [#allocation4], 0 }
   0x3   :  { %17 = vsyncpa [#allocation4 + $0x1], 0  ;;  %s1188_s21 = smov 0   ;;  %s1190_s22 = smov 0  }
   0x4   :  { %s1192_s23 = smov 0   ;;  %s1194_s24 = smov 0  }
   0x5 LB: > { %s1209_s25 = sadd.s32 4294967295, %s1113_s24   ;;  %s781_s26 = sadd.s32 4294967294, %s1113_s24   ;;  %s1113_s24 = sphi %s1194_s24, %s1457_s24   ;;  %s1109_s23 = sphi %s1192_s23, %s1456_s23   ;;  %s1105_s22 = sphi %s1190_s22, %s1455_s22   ;;  %s1101_s21 = sphi %s1188_s21, %s1454_s21  }
   0x6   : > { %s1213_s27 = sadd.s32 1, %s1113_s24   ;;  %s30_s28 = sadd.s32 1, %s1109_s23 }
   0x7   : > { %s27_s29 = ssub.s32 %s1113_s24, %s1213_s27  ;;  %p37_p0 = scmp.ne.s32.totalorder %s1109_s23, %s1105_s22 }
   0x8   : > { %p28_p1 = scmp.eq.s32.totalorder %s27_s29, 0  ;;  %p38_p2 = scmp.eq.s32.totalorder %s1113_s24, 0 }
   0x9   : > { %p43_p3 = scmp.ne.s32.totalorder %s1105_s22, %s1101_s21  ;;  %p44_p4 = scmp.eq.s32.totalorder %s1209_s25, 0 }
   0xa   : > { %s1225_s30 = scalar_select %p28_p1, %s1109_s23, %s30_s28  }
   0xb   : > { %p39_p5 = por %p38_p2, %p37_p0  ;;  %p1227_p6 = por %p44_p4, %p43_p3 }
   0xc   : > { %p151_p7 = scmp.eq.s32.totalorder %s1209_s25, 1  ;;  %p157_p8 = scmp.eq.s32.totalorder %s781_s26, 1 }
   0xd   : > { %p1448_p11 = scmp.ge.s32.totalorder %s1113_s24, 2 }
   0xe   : > { %p1232_p9 = por %p151_p7, %p37_p0  ;;  %p1236_p10 = por %p157_p8, %p43_p3 }
   0xf   : > { %211 = sbr.rel (%p1448_p11) target bundleno = 57 (0x39), region = 32 }
  0x10   : > { %s1451_s9 = scalar_select %p1236_p10, 1, 0 }
  0x16   : > { %214 = sbr.rel (!%p39_p5) target bundleno = 57 (0x39), region = 36  ;;  %s215_s10 = sand.u32 (%p39_p5), 1, %s1109_s23  }
  0x17   : > { %s785_s11 = sshll.u32 (%p39_p5), %s1113_s24, 1  ;;  %s784_s12 = sshll.u32 (%p39_p5), %s215_s10, 4 }
  0x18   : > { %s221_s13 = ssub.s32 (%p39_p5), 3, %s785_s11  ;;  %s1248_s16 = scalar_lea.sflag (%p39_p5), [#allocation3], %s215_s10 }
  0x19   : > { %p222_p12 = scmp.lt.s32.totalorder (%p39_p5), %s221_s13, 2  ;;  %s219_s17 = scalar_lea.vmem (%p39_p5), [#allocation2], %s784_s12 }
  0x1d   : > { %s1459_s13 = smov (!%p222_p12, %s221_s13), 2 }
  0x1e   : > { %s1245_s14 = sshll.u32 %s1459_s13, 7 }
  0x1f   : > { %s226_s15 = ssub.s32 256, %s1245_s14 }
  0x20   : > { %227 = vsyncadd %s1248_s16, %s226_s15  ;;  %p787_p13 = scmp.ne.s32.totalorder %s1245_s14, 0  ;;  %s825_s18 = sshll.u32 %s1113_s24, 8 }
  0x21   : > { %s1256_s26 = scalar_lea.hbm %s1441_s0, %s825_s18  ;;  %s232_s28 = sshll.u32 %s219_s17, 4  ;;  %s1258_s28 = int_to_ptr.vmem [resolvable:$true] %s232_s28 }
  0x22   : > { %s987_s29 = scalar_lea.hbm %s1256_s26, %s1245_s14  ;;  %s991_s12 = scalar_lea.hbm %s1441_s0, 384 }
  0x23   : > { %p988_p0 = scmp.ne.s32.totalorder %s1256_s26, %s987_s29  ;;  %p992_p3 = scmp.lt.u32.totalorder %s1256_s26, %s1441_s0 }
  0x24   : > { %p993_p4 = scmp.lt.u32.totalorder %s991_s12, %s987_s29  ;;  %p995_p7 = scmp.lt.u32.totalorder %s987_s29, %s1256_s26 }
  0x25   : > { %p989_p1 = pnand %p988_p0, %p787_p13 }
  0x26   : > { %p994_p5 = por %p993_p4, %p992_p3 }
  0x27   : > { %p990_p2 = pneg %p989_p1 }
  0x28   : > { %p996_p8 = por %p995_p7, %p994_p5 }
  0x2a   : > { %p997_p12 = pnand %p996_p8, %p990_p2 }
  0x2c   : > { %1000 = shalt.err (!%p997_p12)
}
  0x2d   : > { %s1001_s17 = scalar_lea.vmem %s1258_s28, %s1245_s14  ;;  %s1147_s18 = smov [#allocation2]  }
  0x2e   : > { %p1002_p0 = scmp.ne.s32.totalorder %s1258_s28, %s1001_s17  ;;  %s1005_s19 = sshll.u32 %s1147_s18, 4  ;;  %s1006_s19 = int_to_ptr.vmem [resolvable:$false] %s1005_s19 }
  0x2f   : > { %s1007_s20 = scalar_lea.vmem %s1006_s19, 512  ;;  %p1008_p10 = scmp.lt.s32.totalorder %s1258_s28, %s1006_s19 }
  0x30   : > { %p1003_p1 = pnand %p1002_p0, %p787_p13  ;;  %p1009_p3 = scmp.lt.s32.totalorder %s1007_s20, %s1001_s17 }
  0x32   : > { %p1004_p11 = pneg %p1003_p1  ;;  %p1010_p4 = por %p1009_p3, %p1008_p10 }
  0x34   : > { %p1011_p5 = pnand %p1010_p4, %p1004_p11 }
  0x36   : > { %1014 = shalt.err (!%p1011_p5)
}
  0x37   : > { %s1148_s29 = smov 128   ;;  %s1149_s10 = smov 8  }
  0x38   : > { %238 = dma.hbm_to_vmem [thread:$0]  (%p787_p13), %s1256_s26, %s1245_s14, %s1258_s28, %s1248_s16, %s1148_s29, %s1148_s29, %s1149_s10  }
  0x39 PF: > { %p791_p2 = scmp.ge.s32.totalorder %s1113_s24, 1  ;;  %p240_p7 = scmp.lt.s32.totalorder %s1113_s24, 3 }
  0x3b   : > { %p241_p8 = pnand %p791_p2, %p240_p7 }
  0x3c   : > { %s1288_s11 = sand.u32 (!%p241_p8), 1, %s1105_s22  }
  0x3d   : > { %244 = sbr.rel (%p241_p8) target bundleno = 604 (0x25c), region = 40  ;;  %s1291_s12 = sshll.u32 (!%p241_p8), %s1288_s11, 4 }
  0x3e   : > { %s247_s13 = scalar_lea.sflag (!%p241_p8), [#allocation3], %s1288_s11  ;;  %s250_s15 = scalar_lea.vmem (!%p241_p8), [#allocation2], %s1291_s12 }
  0x44   : > { %1092 = dma.done.wait (%p1227_p6), %s247_s13, 256  }
  0x45   : > { %1094 = vsyncadd (%p1227_p6), %s247_s13, 4294967040  ;;  %vm311_vm0 = vcmask 261120   ;;  %v300_v0 = vld [vmem:[%s1442_s1] sm:$0xff]  ;;  %v301_v1 = vld [vmem:[%s1442_s1 + $0x8] sm:$0xff]  ;;  %s1329_s18 = scalar_lea.vmem [#allocation5], %s1291_s12  ;;  %vm489_vm1 = vcmask 31744  }
  0x46   : > { %v302_v2 = vld [vmem:[%s1442_s1 + $0x10] sm:$0xff]  ;;  %v864_v3 = vpack.c.bf16 %v301_v1, %v300_v0  ;;  %v303_v4 = vld [vmem:[%s1442_s1 + $0x18] sm:$0xff]  ;;  %v397_v8 = vld [vmem:[%s1444_s3] sm:$0xff]  ;;  %s1343_s7 = scalar_lea.vmem [#allocation6], %s1291_s12   ;;  %s493_s29 = scalar_lea.sflag [#allocation4], %s1288_s11 }
  0x47   : > { %v298_v5 = vld [vmem:[%s250_s15] sm:$0xff]  ;;  %v868_v6 = vpack.c.bf16 %v303_v4, %v302_v2  ;;  %v299_v7 = vld [vmem:[%s250_s15 + $0x8] sm:$0xff]  ;;  %s803_s10 = sshll.u32 (%p1232_p9), %s1209_s25, 1 }
  0x48   : > { %850 = vmatprep.mubr.msk.f32.mxu0 %vm311_vm0, %v298_v5  ;;  %865 = vmatprep.subr.bf16.mxu0 %v864_v3  ;;  %v398_v9 = vld [vmem:[%s1444_s3 + $0x8] sm:$0xff]  ;;  %v399_v10 = vld [vmem:[%s1444_s3 + $0x10] sm:$0xff]  ;;  %v400_v12 = vld [vmem:[%s1444_s3 + $0x18] sm:$0xff]  ;;  %s505_s13 = ssub.s32 (%p1232_p9), 3, %s803_s10 }
  0x49   : > { %867 = vmatpush3.bf16.msra.mxu0 %v864_v3  ;;  %v872_v11 = vpack.c.bf16 %v398_v9, %v397_v8  ;;  %v876_v13 = vpack.c.bf16 %v400_v12, %v399_v10  ;;  %v795_v14 = vld [vmem:[%s1443_s2] ss:$0 sm:$0xff]  ;;  %p506_p6 = scmp.lt.s32.totalorder (%p1232_p9), %s505_s13, 2 }
  0x4a   : > { %869 = vmatprep.subr.bf16.mxu0 %v868_v6  ;;  %v798_v21 = vld [vmem:[%s1445_s4] ss:$0 sm:$0xff] }
  0x4b   : > { %873 = vmatprep.subr.bf16.mxu1 %v872_v11 }
  0x4c   : > { %875 = vmatpush3.bf16.msra.mxu1 %v872_v11 }
  0x4d   : > { %871 = vmatpush3.bf16.msra.mxu0 %v868_v6  ;;  %877 = vmatprep.subr.bf16.mxu1 %v876_v13 }
  0x50   : > { %851 = vmatmul.mubr.msk.f32.vlgmr.msra.gmra.mrb[0].mxu0 %vm311_vm0, %v299_v7  ;;  %879 = vmatpush3.bf16.msra.mxu1 %v876_v13 }
 0x123   : > { %v852_v15 = vpop.f32.mrb[0].mxu0 }
 0x124   : > { %v390_v16 = vadd.f32 %v852_v15, %v795_v14  ;;  %v384_v17 = vpop.f32.mrb[1].mxu0 }
 0x125   : > { %v385_v18 = vadd.f32 %v795_v14, %v384_v17 }
 0x126   : > { %394 = vst.msk [vmem:[%s1329_s18 + $0x8] sm:$0xff] %vm311_vm0, %v390_v16 }
 0x127   : > { %393 = vst.msk [vmem:[%s1329_s18] sm:$0xff] %vm311_vm0, %v385_v18 }
 0x12d   : > { %v396_v20 = vld [vmem:[%s1329_s18 + $0x8] sm:$0xff] }
 0x12e   : > { %v395_v19 = vld [vmem:[%s1329_s18] sm:$0xff] }
 0x12f   : > { %861 = vmatprep.mubr.msk.f32.mxu1 %vm311_vm0, %v395_v19 }
 0x130   : > { %862 = vmatmul.mubr.msk.f32.vlgmr.msra.gmra.mrb[0].mxu1 %vm311_vm0, %v396_v20 }
 0x201   : > { %503 = sbr.rel (!%p1232_p9) target bundleno = 548 (0x224), region = 48 }
 0x203   : > { %v863_v22 = vpop.f32.mrb[0].mxu1 }
 0x204   : > { %v486_v23 = vadd.f32 %v863_v22, %v798_v21  ;;  %v480_v24 = vpop.f32.mrb[1].mxu1 }
 0x205   : > { %v481_v25 = vadd.f32 %v798_v21, %v480_v24 }
 0x206   : > { %491 = vst.msk [vmem:[%s1343_s7 + $0x8] sm:$0xff] %vm489_vm1, %v486_v23 }
 0x207   : > { %490 = vst.msk [vmem:[%s1343_s7] sm:$0xff] %vm489_vm1, %v481_v25 }
 0x208   : > { %s1461_s13 = smov (!%p506_p6, %s505_s13), 2 }
 0x209   : > { %s1351_s14 = sshll.u32 %s1461_s13, 7 }
 0x20a   : > { %s510_s16 = ssub.s32 256, %s1351_s14 }
 0x20b   : > { %511 = vsyncadd %s493_s29, %s510_s16  ;;  %p805_p10 = scmp.ne.s32.totalorder %s1351_s14, 0  ;;  %s826_s12 = sshll.u32 %s1209_s25, 8 }
 0x20c   : > { %s1361_s15 = scalar_lea.hbm %s1446_s5, %s826_s12  ;;  %s516_s17 = sshll.u32 %s1329_s18, 4  ;;  %s1364_s17 = int_to_ptr.vmem [resolvable:$true] %s516_s17 }
 0x20d   : > { %s1015_s19 = scalar_lea.vmem %s1364_s17, %s1351_s14  ;;  %s1150_s20 = smov [#allocation5]  }
 0x20e   : > { %p1016_p11 = scmp.ne.s32.totalorder %s1364_s17, %s1015_s19  ;;  %s1019_s10 = sshll.u32 %s1150_s20, 4  ;;  %s1020_s10 = int_to_ptr.vmem [resolvable:$false] %s1019_s10 }
 0x20f   : > { %s1021_s13 = scalar_lea.vmem %s1020_s10, 512  ;;  %p1022_p0 = scmp.lt.s32.totalorder %s1364_s17, %s1020_s10 }
 0x210   : > { %p1017_p13 = pnand %p1016_p11, %p805_p10  ;;  %p1023_p1 = scmp.lt.s32.totalorder %s1021_s13, %s1015_s19 }
 0x212   : > { %p1018_p12 = pneg %p1017_p13  ;;  %p1024_p3 = por %p1023_p1, %p1022_p0 }
 0x214   : > { %p1025_p4 = pnand %p1024_p3, %p1018_p12 }
 0x216   : > { %1028 = shalt.err (!%p1025_p4)
}
 0x217   : > { %s1029_s18 = scalar_lea.hbm %s1361_s15, %s1351_s14  ;;  %s1033_s26 = scalar_lea.hbm %s1446_s5, 384 }
 0x218   : > { %p1030_p5 = scmp.ne.s32.totalorder %s1361_s15, %s1029_s18  ;;  %p1034_p8 = scmp.lt.u32.totalorder %s1361_s15, %s1446_s5 }
 0x219   : > { %p1035_p6 = scmp.lt.u32.totalorder %s1033_s26, %s1029_s18  ;;  %p1037_p13 = scmp.lt.u32.totalorder %s1029_s18, %s1361_s15 }
 0x21a   : > { %p1031_p2 = pnand %p1030_p5, %p805_p10 }
 0x21b   : > { %p1036_p11 = por %p1035_p6, %p1034_p8 }
 0x21c   : > { %p1032_p7 = pneg %p1031_p2 }
 0x21d   : > { %p1038_p12 = por %p1037_p13, %p1036_p11 }
 0x21f   : > { %p1039_p0 = pnand %p1038_p12, %p1032_p7 }
 0x221   : > { %1042 = shalt.err (!%p1039_p0)
}
 0x222   : > { %s1151_s20 = smov 128   ;;  %s1152_s10 = smov 8  }
 0x223   : > { %522 = dma.vmem_to_hbm [thread:$0]  (%p805_p10), %s1364_s17, %s1351_s14, %s1361_s15, %s493_s29, %s1151_s20, %s1151_s20, %s1152_s10  }
 0x224 PF: > { %525 = sbr.rel (!%p1232_p9) target bundleno = 604 (0x25c), region = 52  ;;  %s809_s13 = sshll.u32 (%p1232_p9), %s1209_s25, 1 }
 0x225   : > { %s827_s18 = sshll.u32 (%p1232_p9), %s1209_s25, 4  ;;  %s527_s16 = ssub.s32 (%p1232_p9), 3, %s809_s13 }
 0x226   : > { %s1399_s28 = scalar_lea.vmem (%p1232_p9), %s1447_s6, %s827_s18   ;;  %p528_p1 = scmp.lt.s32.totalorder (%p1232_p9), %s527_s16, 2 }
 0x22b   : > { %s1463_s16 = smov (!%p528_p1, %s527_s16), 2 }
 0x22c   : > { %s810_s11 = sshll.u32 %s1463_s16, 7 }
 0x22d   : > { %p813_p10 = scmp.eq.s32.totalorder %s810_s11, 0 }
 0x22e   : > { %s1405_s8 = sshrl.u32 (!%p813_p10), %s1463_s16, 1 }
 0x22f   : > { %536 = sbr.rel (%p813_p10) target bundleno = 604 (0x25c), region = 56  ;;  %p814_p9 = scmp.le.s32.totalorder (!%p813_p10), %s1405_s8, 0 }
 0x236   : > { %725 = sbr.rel (%p814_p9) target bundleno = 583 (0x247), region = 151  ;;  %s1115_s25 = smov (!%p814_p9), %s1399_s28  }
 0x237   : > { %s1119_s29 = smov (!%p814_p9), %s1343_s7   ;;  %s1123_s14 = smov (!%p814_p9), 0  }
 0x238   : > { %s1127_s15 = smov (!%p814_p9), 0  }
 0x23d LB: >> { %v600_v26 = vld [vmem:[%s1121_s29] sm:$0xff]  ;;  %v602_v27 = vld [vmem:[%s1121_s29 + $0x8] sm:$0xff]  ;;  %s604_s17 = sadd.s32 1, %s1125_s14  ;;  %s594_s15 = sadd.s32 1, %s1129_s15   ;;  %s1129_s15 = sphi %s1127_s15, %s594_s15   ;;  %s1125_s14 = sphi %s1123_s14, %s1124_s14   ;;  %s1121_s29 = sphi %s1119_s29, %s609_s29   ;;  %s1117_s25 = sphi %s1115_s25, %s610_s25  }
 0x23e   : >> { %601 = vst [vmem:[%s1117_s25] sm:$0xff] %v600_v26  ;;  %603 = vst [vmem:[%s1117_s25 + $0x8] sm:$0xff] %v602_v27  ;;  %p605_p3 = scmp.ge.s32.totalorder %s604_s17, %s1405_s8  ;;  %p593_p4 = scmp.ge.s32.totalorder %s594_s15, %s1405_s8 }
 0x240   : >> { %s1465_s17 = smov (%p605_p3, %s604_s17), 0  ;;  %596 = sbr.rel (!%p593_p4) target bundleno = 573 (0x23d), region = 157 }
 0x241   : >> { %s815_s19 = sshll.u32 %s1465_s17, 4  ;;  %s1124_s14 = smov %s1465_s17  }
 0x242   : >> { %s609_s29 = scalar_lea.vmem %s1343_s7, %s815_s19 [#allocation6]   ;;  %s610_s25 = scalar_lea.vmem %s1399_s28, %s815_s19  }
 0x247 PF: > { %s1415_s20 = sand.u32 1, %s1463_s16   ;;  %s828_s10 = sshll.u32 %s1405_s8, 4 }
 0x248   : > { %s615_s13 = scalar_lea.vmem %s1343_s7, %s828_s10 [#allocation6]   ;;  %s617_s18 = scalar_lea.vmem %s1399_s28, %s828_s10  }
 0x249   : > { %p820_p5 = scmp.le.s32.totalorder %s1415_s20, 0 }
 0x24a   : > { %s1131_s12 = smov (!%p820_p5), %s617_s18   ;;  %s1135_s26 = smov (!%p820_p5), %s615_s13  }
 0x24b   : > { %739 = sbr.rel (%p820_p5) target bundleno = 604 (0x25c), region = 162  ;;  %s1139_s11 = smov (!%p820_p5), 0  }
 0x24c   : > { %s1143_s25 = smov (!%p820_p5), 0  }
 0x252 LB: >> { %v627_v28 = vld [vmem:[%s1137_s26] sm:$0xff]  ;;  %s629_s16 = sadd.s32 1, %s1141_s11  ;;  %s621_s25 = sadd.s32 1, %s1145_s25   ;;  %s1145_s25 = sphi %s1143_s25, %s621_s25   ;;  %s1141_s11 = sphi %s1139_s11, %s1140_s11   ;;  %s1137_s26 = sphi %s1135_s26, %s634_s26   ;;  %s1133_s12 = sphi %s1131_s12, %s635_s12  }
 0x253   : >> { %628 = vst [vmem:[%s1133_s12] sm:$0xff] %v627_v28  ;;  %p630_p2 = scmp.ge.s32.totalorder %s629_s16, %s1415_s20  ;;  %p620_p7 = scmp.ge.s32.totalorder %s621_s25, %s1415_s20 }
 0x255   : >> { %s1467_s16 = smov (%p630_p2, %s629_s16), 0  ;;  %623 = sbr.rel (!%p620_p7) target bundleno = 594 (0x252), region = 168 }
 0x256   : >> { %s821_s7 = sshll.u32 %s1467_s16, 3  ;;  %s1140_s11 = smov %s1467_s16  }
 0x257   : >> { %s634_s26 = scalar_lea.vmem %s615_s13, %s821_s7 [#allocation6]   ;;  %s635_s12 = scalar_lea.vmem %s617_s18, %s821_s7  }
 0x25c PF: > { %s647_s28 = sand.u32 1, %s1101_s21   ;;  %p1452_p8 = scmp.ne.s32.totalorder %s1451_s9, 0 }
 0x25d   : > { %p1453_p6 = scmp.ge.s32.totalorder %s1113_s24, 2  ;;  %s648_s8 = scalar_lea.sflag [#allocation4], %s647_s28 }
 0x25f   : > { %p883_p11 = pnand %p1453_p6, %p1452_p8 }
 0x261   : > { %1096 = dma.done.wait (!%p883_p11), %s648_s8, 256  }
 0x262   : > { %1098 = vsyncadd (!%p883_p11), %s648_s8, 4294967040  ;;  %p20_p13 = scmp.ge.s32.totalorder %s1213_s27, 4   ;;  %s1454_s21 = smov %s1105_s22 }
 0x263   : > { %s1455_s22 = smov %s1109_s23  ;;  %s1456_s23 = smov %s1225_s30 }
 0x264   : > { %s1457_s24 = smov %s1213_s27  ;;  %22 = sbr.rel (!%p20_p13) target bundleno = 5 (0x5), region = 179 }
 0x26b   :  { %660 = vsyncpa [#allocation3], 1 }
 0x26c   :  { %662 = vsyncpa [#allocation3 + $0x1], 1 }
 0x26d   :  { %663 = vsyncpa [#allocation4], 1 }
 0x26e   :  { %665 = vsyncpa [#allocation4 + $0x1], 1 }

</bundles_post_ra>
